<compile_context>
chip_gen: v7x
topology: tpu7x:2x2x1
jax: 0.10.0
libtpu: 0.0.40
codegen_flags: <defaults>
</compile_context>

<pallas_src>
import numpy as np
import jax
import jax.numpy as jnp
from jax.experimental import pallas as pl
from jax.experimental.pallas import tpu as pltpu

N_LABELS = 14        # the PyTorch module hard-codes the split at column 14
TILE_B_MAX = 8192    # batch rows per grid step (~1.4 MiB/tile of f32 inputs)


def _round_up(x, m):
    return ((x + m - 1) // m) * m


def _make_ldam_kernel(batch, n_labels, tile_b, padded):
    """Kernel factory; `batch` / `n_labels` / `tile_b` / `padded` are static."""
    inv_count = 1.0 / float(batch * n_labels)

    def _softplus(x):
        # Numerically stable softplus: exp(-|x|) is in (0, 1], so log(1 + y)
        # matches log1p(y) to f32 precision here.
        return jnp.maximum(x, 0.0) + jnp.log(1.0 + jnp.exp(-jnp.abs(x)))

    def kernel(out_ref, tgt_ref, deltas_ref, loss_ref):
        i = pl.program_id(0)

        @pl.when(i == 0)
        def _init():
            loss_ref[...] = jnp.zeros_like(loss_ref)

        # Split logits inside the kernel (static lane slices of one block).
        pos = out_ref[:, :n_labels]                 # (tile_b, n_labels)
        neg = out_ref[:, n_labels:2 * n_labels]     # (tile_b, n_labels)
        tgt = tgt_ref[...]                          # (tile_b, n_labels)
        pos_d = deltas_ref[0:1, :]                  # (1, n_labels) -> bcast over rows
        neg_d = deltas_ref[1:2, :]                  # (1, n_labels)

        # NOTE: torch.sigmoid(output) in the reference forward is dead code
        # (its result is immediately overwritten), so it is not computed here.
        sp_pos = _softplus(neg - pos + pos_d)       # weighted by target
        sp_neg = _softplus(pos - neg + neg_d)       # weighted by (1 - target)
        # t*a + (1-t)*b == b + t*(a - b)  (one fewer multiply on the VPU).
        per_elem = sp_neg + tgt * (sp_pos - sp_neg)

        if padded:
            # Zero the contribution of batch-padding rows (only traced if needed).
            row = i * tile_b + jax.lax.broadcasted_iota(jnp.int32, (tile_b, 1), 0)
            per_elem = jnp.where(row < batch, per_elem, 0.0)

        # Per-tile sum -> (1, 1), accumulated in the resident output block.
        tile_sum = jnp.sum(jnp.sum(per_elem, axis=1, keepdims=True),
                           axis=0, keepdims=True)
        loss_ref[...] += tile_sum

        @pl.when(i == pl.num_programs(0) - 1)
        def _finalize():
            loss_ref[...] = loss_ref[...] * inv_count

    return kernel


def make_ldam_deltas(pos_neg_sample_nums, C=0.5):
    """Mirrors LDAMLoss.__init__ margin construction."""
    counts = np.asarray(pos_neg_sample_nums, dtype=np.float64)   # (2, N_LABELS)
    m_list = 1.0 / np.sqrt(np.sqrt(counts))
    m_list = m_list * (C / np.max(m_list, axis=0))               # per-column scaling
    pos_deltas = jnp.asarray(m_list[0, :], dtype=jnp.float32)
    neg_deltas = jnp.asarray(m_list[1, :], dtype=jnp.float32)
    return pos_deltas, neg_deltas


def ldam_loss(output, target, pos_deltas, neg_deltas):
    output = output.astype(jnp.float32)
    target = target.astype(jnp.float32)
    B, n_labels = target.shape
    assert output.shape[1] == 2 * n_labels

    # Pack both delta rows into one small resident input.
    deltas = jnp.stack([pos_deltas, neg_deltas]).astype(jnp.float32)  # (2, n_labels)

    # Batch tiling: tile_b multiple of 8 (sublane rule); pad B to a full tile.
    tile_b = min(TILE_B_MAX, _round_up(B, 8))
    b_pad = _round_up(B, tile_b)
    padded = b_pad != B
    if padded:
        output = jnp.pad(output, ((0, b_pad - B), (0, 0)))
        target = jnp.pad(target, ((0, b_pad - B), (0, 0)))
    n_tiles = b_pad // tile_b

    kernel = _make_ldam_kernel(B, n_labels, tile_b, padded)

    loss = pl.pallas_call(
        kernel,
        out_shape=jax.ShapeDtypeStruct((1, 1), jnp.float32),
        grid_spec=pltpu.PrefetchScalarGridSpec(
            num_scalar_prefetch=0,
            grid=(n_tiles,),
            in_specs=[
                pl.BlockSpec((tile_b, 2 * n_labels), lambda i: (i, 0)),  # logits
                pl.BlockSpec((tile_b, n_labels), lambda i: (i, 0)),      # target
                pl.BlockSpec((2, n_labels), lambda i: (0, 0)),           # deltas (resident)
            ],
            out_specs=pl.BlockSpec((1, 1), lambda i: (0, 0)),            # accumulator
        ),
        compiler_params=pltpu.CompilerParams(
            dimension_semantics=("arbitrary",)),   # grid accumulates into one output
    )(output, target, deltas)
    return loss[0, 0]


def ldam_loss_ref(output, target, pos_deltas, neg_deltas):
    """Pure-JAX reference mirroring the PyTorch forward (original formulation)."""
    n_labels = target.shape[1]
    inv_target = 1.0 - target
    pos_score = output[:, :n_labels]
    neg_score = output[:, n_labels:2 * n_labels]
    exp_pos = jnp.exp(pos_score)
    exp_pos_md = jnp.exp(pos_score - pos_deltas[None, :])
    exp_neg = jnp.exp(neg_score)
    exp_neg_md = jnp.exp(neg_score - neg_deltas[None, :])
    first = -target * jnp.log(exp_pos_md / (exp_pos_md + exp_neg))
    second = -inv_target * jnp.log(exp_neg_md / (exp_neg_md + exp_pos))
    return jnp.mean(first + second)


if __name__ == "__main__":
    key = jax.random.PRNGKey(0)
    k_out, k_tgt, k_cnt, k_out2, k_tgt2 = jax.random.split(key, 5)

    # Deterministic "class count" parameters: shape (2, N_LABELS), positive.
    pos_neg_sample_nums = np.asarray(
        jax.random.randint(k_cnt, (2, N_LABELS), minval=10, maxval=1000))
    pos_deltas, neg_deltas = make_ldam_deltas(pos_neg_sample_nums, C=0.5)

    # Case 1: small batch, multiple of 8 (single tile, no padding path).
    B = 8
    output = jax.random.normal(k_out, (B, 2 * N_LABELS), dtype=jnp.float32)
    target = (jax.random.uniform(k_tgt, (B, N_LABELS)) > 0.5).astype(jnp.float32)
    loss = jax.block_until_ready(ldam_loss(output, target, pos_deltas, neg_deltas))
    ref = jax.block_until_ready(ldam_loss_ref(output, target, pos_deltas, neg_deltas))
    assert np.allclose(np.asarray(loss), np.asarray(ref), rtol=1e-5, atol=1e-5), (
        loss, ref)

    # Case 2: batch not a multiple of 8 (exercises the in-kernel padding mask).
    B2 = 20
    output2 = jax.random.normal(k_out2, (B2, 2 * N_LABELS), dtype=jnp.float32)
    target2 = (jax.random.uniform(k_tgt2, (B2, N_LABELS)) > 0.5).astype(jnp.float32)
    loss2 = jax.block_until_ready(ldam_loss(output2, target2, pos_deltas, neg_deltas))
    ref2 = jax.block_until_ready(ldam_loss_ref(output2, target2, pos_deltas, neg_deltas))
    assert np.allclose(np.asarray(loss2), np.asarray(ref2), rtol=1e-5, atol=1e-5), (
        loss2, ref2)

    print("KERNEL_OK")
</pallas_src>

<mosaic_0001>
module attributes {stable_mosaic.version = 11 : i64} {
  func.func @kernel(%arg0: i32, %arg1: memref<8x28xf32, #tpu.memory_space<vmem>>, %arg2: memref<8x14xf32, #tpu.memory_space<vmem>>, %arg3: memref<2x14xf32, #tpu.memory_space<vmem>>, %arg4: memref<1x1xf32, #tpu.memory_space<vmem>>) attributes {dimension_semantics = [#tpu.dimension_semantics<arbitrary>], iteration_bounds = array<i64: 1>, scalar_prefetch = 0 : i64, scratch_operands = 0 : i64, tpu.core_type = #tpu.core_type<tc>, window_params = [{transform_indices = @transform_0, window_bounds = array<i64: 8, 28>}, {transform_indices = @transform_1, window_bounds = array<i64: 8, 14>}, {pipeline_mode = #tpu.pipeline_mode<synchronous>, transform_indices = @transform_2, window_bounds = array<i64: 2, 14>}, {pipeline_mode = #tpu.pipeline_mode<synchronous>, transform_indices = @transform_3, window_bounds = array<i64: 1, 1>}]} {
    %c0_i32 = arith.constant 0 : i32
    %0 = arith.cmpi eq, %arg0, %c0_i32 : i32
    %1 = arith.extui %0 : i1 to i32
    %c0_i32_0 = arith.constant 0 : i32
    %2 = arith.cmpi ne, %1, %c0_i32_0 : i32
    scf.if %2 {
      %cst_21 = arith.constant 0.000000e+00 : f32
      %47 = vector.broadcast %cst_21 : f32 to vector<1x1xf32>
      %c0_22 = arith.constant 0 : index
      %c0_23 = arith.constant 0 : index
      %48 = vector.load %arg4[%c0_22, %c0_23] : memref<1x1xf32, #tpu.memory_space<vmem>>, vector<1x1xf32>
      tpu.vector_store %arg4[%c0_22, %c0_23], %47 {strides = array<i32>} : memref<1x1xf32, #tpu.memory_space<vmem>>, vector<1x1xf32>,
    } else {
    }
    %c0 = arith.constant 0 : index
    %c0_1 = arith.constant 0 : index
    %3 = vector.load %arg1[%c0, %c0_1] : memref<8x28xf32, #tpu.memory_space<vmem>>, vector<8x14xf32>
    %c0_2 = arith.constant 0 : index
    %c14 = arith.constant 14 : index
    %4 = vector.load %arg1[%c0_2, %c14] : memref<8x28xf32, #tpu.memory_space<vmem>>, vector<8x14xf32>
    %c0_3 = arith.constant 0 : index
    %c0_4 = arith.constant 0 : index
    %5 = vector.load %arg2[%c0_3, %c0_4] : memref<8x14xf32, #tpu.memory_space<vmem>>, vector<8x14xf32>
    %c0_5 = arith.constant 0 : index
    %c0_6 = arith.constant 0 : index
    %6 = vector.load %arg3[%c0_5, %c0_6] : memref<2x14xf32, #tpu.memory_space<vmem>>, vector<1x14xf32>
    %c1 = arith.constant 1 : index
    %c0_7 = arith.constant 0 : index
    %7 = vector.load %arg3[%c1, %c0_7] : memref<2x14xf32, #tpu.memory_space<vmem>>, vector<1x14xf32>
    %8 = arith.subf %4, %3 : vector<8x14xf32>
    %9 = vector.broadcast %6 : vector<1x14xf32> to vector<8x14xf32>
    %10 = arith.addf %8, %9 : vector<8x14xf32>
    %cst = arith.constant 0.000000e+00 : f32
    %11 = vector.broadcast %cst : f32 to vector<8x14xf32>
    %12 = arith.maximumf %10, %11 : vector<8x14xf32>
    %13 = math.absf %10 : vector<8x14xf32>
    %cst_8 = arith.constant 0.000000e+00 : f32
    %14 = vector.broadcast %cst_8 : f32 to vector<8x14xf32>
    %15 = arith.subf %14, %13 : vector<8x14xf32>
    %16 = math.exp %15 : vector<8x14xf32>
    %cst_9 = arith.constant 1.000000e+00 : f32
    %17 = vector.broadcast %cst_9 : f32 to vector<8x14xf32>
    %18 = arith.addf %17, %16 : vector<8x14xf32>
    %19 = math.log %18 : vector<8x14xf32>
    %20 = arith.addf %12, %19 : vector<8x14xf32>
    %21 = arith.subf %3, %4 : vector<8x14xf32>
    %22 = vector.broadcast %7 : vector<1x14xf32> to vector<8x14xf32>
    %23 = arith.addf %21, %22 : vector<8x14xf32>
    %cst_10 = arith.constant 0.000000e+00 : f32
    %24 = vector.broadcast %cst_10 : f32 to vector<8x14xf32>
    %25 = arith.maximumf %23, %24 : vector<8x14xf32>
    %26 = math.absf %23 : vector<8x14xf32>
    %cst_11 = arith.constant 0.000000e+00 : f32
    %27 = vector.broadcast %cst_11 : f32 to vector<8x14xf32>
    %28 = arith.subf %27, %26 : vector<8x14xf32>
    %29 = math.exp %28 : vector<8x14xf32>
    %cst_12 = arith.constant 1.000000e+00 : f32
    %30 = vector.broadcast %cst_12 : f32 to vector<8x14xf32>
    %31 = arith.addf %30, %29 : vector<8x14xf32>
    %32 = math.log %31 : vector<8x14xf32>
    %33 = arith.addf %25, %32 : vector<8x14xf32>
    %34 = arith.subf %20, %33 : vector<8x14xf32>
    %35 = arith.mulf %5, %34 : vector<8x14xf32>
    %36 = arith.addf %33, %35 : vector<8x14xf32>
    %cst_13 = arith.constant dense<0.000000e+00> : vector<8xf32>
    %37 = vector.multi_reduction <add>, %36, %cst_13 [1] : vector<8x14xf32> to vector<8xf32>
    %38 = vector.shape_cast %37 : vector<8xf32> to vector<8x1xf32>
    %cst_14 = arith.constant dense<0.000000e+00> : vector<1xf32>
    %39 = vector.multi_reduction <add>, %38, %cst_14 [0] : vector<8x1xf32> to vector<1xf32>
    %40 = vector.shape_cast %39 : vector<1xf32> to vector<1x1xf32>
    %c0_15 = arith.constant 0 : index
    %c0_16 = arith.constant 0 : index
    %41 = vector.load %arg4[%c0_15, %c0_16] : memref<1x1xf32, #tpu.memory_space<vmem>>, vector<1x1xf32>
    %42 = arith.addf %41, %40 : vector<1x1xf32>
    %c0_17 = arith.constant 0 : index
    %c0_18 = arith.constant 0 : index
    %43 = vector.load %arg4[%c0_17, %c0_18] : memref<1x1xf32, #tpu.memory_space<vmem>>, vector<1x1xf32>
    tpu.vector_store %arg4[%c0_17, %c0_18], %42 {strides = array<i32>} : memref<1x1xf32, #tpu.memory_space<vmem>>, vector<1x1xf32>,
    %c0_i32_19 = arith.constant 0 : i32
    %44 = arith.cmpi eq, %arg0, %c0_i32_19 : i32
    %45 = arith.extui %44 : i1 to i32
    %c0_i32_20 = arith.constant 0 : i32
    %46 = arith.cmpi ne, %45, %c0_i32_20 : i32
    scf.if %46 {
      %c0_21 = arith.constant 0 : index
      %c0_22 = arith.constant 0 : index
      %47 = vector.load %arg4[%c0_21, %c0_22] : memref<1x1xf32, #tpu.memory_space<vmem>>, vector<1x1xf32>
      %cst_23 = arith.constant 0.00892857183 : f32
      %48 = vector.broadcast %cst_23 : f32 to vector<1x1xf32>
      %49 = arith.mulf %47, %48 : vector<1x1xf32>
      %c0_24 = arith.constant 0 : index
      %c0_25 = arith.constant 0 : index
      %50 = vector.load %arg4[%c0_24, %c0_25] : memref<1x1xf32, #tpu.memory_space<vmem>>, vector<1x1xf32>
      tpu.vector_store %arg4[%c0_24, %c0_25], %49 {strides = array<i32>} : memref<1x1xf32, #tpu.memory_space<vmem>>, vector<1x1xf32>,
    } else {
    }
    return
  }
  func.func @transform_0(%arg0: i32) -> (i32, i32) {
    %c0_i32 = arith.constant 0 : i32
    %c0_i32_0 = arith.constant 0 : i32
    return %arg0, %c0_i32 : i32, i32
  }
  func.func @transform_1(%arg0: i32) -> (i32, i32) {
    %c0_i32 = arith.constant 0 : i32
    %c0_i32_0 = arith.constant 0 : i32
    return %arg0, %c0_i32 : i32, i32
  }
  func.func @transform_2(%arg0: i32) -> (i32, i32) {
    %c0_i32 = arith.constant 0 : i32
    %c0_i32_0 = arith.constant 0 : i32
    %c0_i32_1 = arith.constant 0 : i32
    return %c0_i32, %c0_i32_0 : i32, i32
  }
  func.func @transform_3(%arg0: i32) -> (i32, i32) {
    %c0_i32 = arith.constant 0 : i32
    %c0_i32_0 = arith.constant 0 : i32
    %c0_i32_1 = arith.constant 0 : i32
    return %c0_i32, %c0_i32_0 : i32, i32
  }
}

</mosaic_0001>

<bundles_post_ra>
// kernel: tpu_custom_call.1
= control target key start
LH: loop header
LB: loop body
LE: loop exit
PB: predicated region body
PF: predicated region fallthrough
CT: control target
= control target key end

     0   :  { %8 = vsyncpa [#allocation3], 0  ;;  %s298_s0 = inlined_call_operand.hbm [shape: f32[8,28], index: 0, kind: input, shape index: {}]   ;;  %s299_s1 = inlined_call_operand.hbm [shape: f32[8,14], index: 1, kind: input, shape index: {}]   ;;  %s300_s2 = inlined_call_operand.vmem [shape: f32[2,14], index: 2, kind: input, shape index: {}]   ;;  %s301_s3 = inlined_call_operand.hbm [shape: f32[1,1], index: 3, kind: output, shape index: {}]  }
   0x1   :  { %9 = vsyncpa [#allocation6], 0 }
   0x2   :  { %10 = vsyncpa [#allocation4], 0  ;;  %s225_s12 = smov [#allocation2]   ;;  %s226_s14 = smov [#allocation5]  }
   0x3   :  { %s17_s13 = sshll.u32 %s225_s12, 4  ;;  %s27_s15 = sshll.u32 %s226_s14, 4  ;;  %s18_s13 = int_to_ptr.vmem [resolvable:$true] %s17_s13  ;;  %s28_s15 = int_to_ptr.vmem [resolvable:$true] %s27_s15 }
   0x4   :  { %s153_s18 = scalar_lea.hbm %s298_s0, 128 }
   0x5   :  { %p154_p0 = scmp.ne.s32.totalorder %s298_s0, %s153_s18  ;;  %p157_p1 = scmp.lt.u32.totalorder %s153_s18, %s298_s0 }
   0x7   :  { %p159_p2 = pnand %p157_p1, %p154_p0 }
   0x9   :  { %162 = shalt.err (!%p159_p2)
}
   0xa   :  { %s163_s23 = scalar_lea.vmem %s18_s13, 128  ;;  %p168_p4 = scmp.lt.s32.totalorder %s18_s13, %s18_s13 }
   0xb   :  { %p164_p3 = scmp.ne.s32.totalorder %s18_s13, %s163_s23  ;;  %p169_p5 = scmp.lt.s32.totalorder %s163_s23, %s163_s23 }
   0xd   :  { %p170_p6 = por %p169_p5, %p168_p4 }
   0xf   :  { %p171_p7 = pnand %p170_p6, %p164_p3 }
  0x11   :  { %174 = shalt.err (!%p171_p7)
}
  0x12   :  { %20 = dma.hbm_to_vmem [thread:$0]  %s298_s0, 128, %s18_s13, [#allocation3]  }
  0x13   :  { %s175_s28 = scalar_lea.hbm %s299_s1, 128 }
  0x14   :  { %p176_p8 = scmp.ne.s32.totalorder %s299_s1, %s175_s28  ;;  %p179_p9 = scmp.lt.u32.totalorder %s175_s28, %s299_s1 }
  0x16   :  { %p181_p10 = pnand %p179_p9, %p176_p8 }
  0x18   :  { %184 = shalt.err (!%p181_p10)
}
  0x19   :  { %s185_s6 = scalar_lea.vmem %s28_s15, 128  ;;  %p190_p12 = scmp.lt.s32.totalorder %s28_s15, %s28_s15 }
  0x1a   :  { %p186_p11 = scmp.ne.s32.totalorder %s28_s15, %s185_s6  ;;  %p191_p13 = scmp.lt.s32.totalorder %s185_s6, %s185_s6 }
  0x1c   :  { %p192_p0 = por %p191_p13, %p190_p12 }
  0x1e   :  { %p193_p1 = pnand %p192_p0, %p186_p11 }
  0x20   :  { %196 = shalt.err (!%p193_p1)
}
  0x21   :  { %30 = dma.hbm_to_vmem [thread:$0]  %s299_s1, 128, %s28_s15, [#allocation6]  }
  0x22   :  { %219 = dma.done.wait [#allocation3], 128  }
  0x23   :  { %220 = vsyncadd [#allocation3], 4294967168 }
  0x24   :  { %221 = dma.done.wait [#allocation6], 128  }
  0x25   :  { %222 = vsyncadd [#allocation6], 4294967168  ;;  %v45_v0 = vld [vmem:[#allocation2] sm:$0xff]  ;;  %s227_s10 = smov 114   ;;  %s228_s11 = smov 14   ;;  %vm43_vm0 = vcmask 0  }
  0x26   :  { %v137_v1 = vld [vmem:[%s300_s2] ss:$0 sm:$0xff]  ;;  %72 = vrot.lane.b32.xlu0 %v45_v0, %s227_s10  ;;  %v138_v2 = vld [vmem:[%s300_s2 + $0x1] ss:$0 sm:$0xff]  ;;  %v229_v27 = vmov 0.0   ;;  %v46_v31 = vld [vmem:[#allocation5] sm:$0xff] }
  0x27   :  { %59 = vrot.lane.b32.xlu1 %v137_v1, %s228_s11  ;;  %44 = vst.msk [vmem:[#allocation7] sm:$0x1] %vm43_vm0, %v229_v27  ;;  %vm101_vm1 = vcmask 113664   ;;  %s230_s1 = smov [#allocation7]  }
  0x28   :  { %s127_s2 = sshll.u32 %s230_s1, 4  ;;  %s128_s2 = int_to_ptr.vmem [resolvable:$true] %s127_s2 }
  0x29   :  { %s197_s14 = scalar_lea.vmem %s128_s2, 16  ;;  %s201_s15 = scalar_lea.vmem %s128_s2, 32 }
  0x2a   :  { %50 = vrot.lane.b32.xlu0 %v45_v0, %s228_s11  ;;  %p198_p2 = scmp.ne.s32.totalorder %s128_s2, %s197_s14  ;;  %p202_p3 = scmp.lt.s32.totalorder %s128_s2, %s128_s2 }
  0x2b   :  { %p203_p4 = scmp.lt.s32.totalorder %s201_s15, %s197_s14 }
  0x2d   :  { %p204_p5 = por %p203_p4, %p202_p3 }
  0x2e   :  { %v111_v42 = vld [vmem:[#allocation7] sm:$0x1] }
  0x2f   :  { %p205_p6 = pnand %p204_p5, %p198_p2 }
  0x98   :  { %v73_v3 = vpop.permute.xlu0 %72 }
  0x99   :  { %v75_v4 = vsub.f32 %v45_v0, %v73_v3  ;;  %v60_v17 = vpop.permute.xlu1 %59 }
  0x9b   :  { %v80_v5 = vadd.f32 %v138_v2, %v75_v4 }
  0x9c   :  { %v51_v15 = vpop.permute.xlu0 %50 }
  0x9d   :  { %v82_v6 = vand.u32 2147483647, %v80_v5  ;;  %v81_v12 = vmax.f32 %v80_v5, 0.0  ;;  %v53_v16 = vsub.f32 %v45_v0, %v51_v15 }
  0x9f   :  { %v83_v7 = vsub.f32 0.0, %v82_v6  ;;  %v62_v18 = vadd.f32 %v60_v17, %v53_v16 }
  0xa1   :  { %v84_v8 = vmul.f32 1.442695, %v83_v7  ;;  %v64_v19 = vand.u32 2147483647, %v62_v18  ;;  %v63_v25 = vmax.f32 %v62_v18, 0.0 }
  0xa3   :  { %145 = vpow2.f32 %v84_v8  ;;  %v65_v20 = vsub.f32 0.0, %v64_v19 }
  0xa5   :  { %v66_v21 = vmul.f32 1.442695, %v65_v20 }
  0xad   :  { %v146_v9 = vpop.eup %145 }
  0xae   :  { %v86_v10 = vadd.f32 1.0, %v146_v9 }
  0xb0   :  { %147 = vlog2.f32 %v86_v10 }
  0xb1   :  { %149 = vpow2.f32 %v66_v21 }
  0xba   :  { %v148_v11 = vpop.eup %147 }
  0xbb   :  { %v88_v13 = vmul.f32 0.6931472, %v148_v11  ;;  %v150_v22 = vpop.eup %149 }
  0xbc   :  { %v68_v23 = vadd.f32 1.0, %v150_v22 }
  0xbd   :  { %v89_v14 = vadd.f32 %v88_v13, %v81_v12 }
  0xbe   :  { %151 = vlog2.f32 %v68_v23 }
  0xbf   :  { %91 = vrot.lane.b32.xlu1 %v89_v14, %s228_s11 }
  0xc8   :  { %v152_v24 = vpop.eup %151 }
  0xc9   :  { %v70_v26 = vmul.f32 0.6931472, %v152_v24 }
  0xcb   :  { %v71_v28 = vadd.f32 %v70_v26, %v63_v25 }
 0x131   :  { %v92_v29 = vpop.permute.xlu1 %91 }
 0x132   :  { %v94_v30 = vsub.f32 %v71_v28, %v92_v29 }
 0x134   :  { %96 = vrot.lane.b32.xlu0 %v94_v30, %s227_s10 }
 0x1a6   :  { %v97_v32 = vpop.permute.xlu0 %96 }
 0x1a7   :  { %v99_v33 = vmul.f32 %v97_v32, %v46_v31 }
 0x1a9   :  { %v100_v34 = vadd.f32 %v99_v33, %v89_v14 }
 0x1ab   :  { %v102_v35 = vsel %vm101_vm1, %v100_v34, 0.0 }
 0x1ac   :  { %103 = vadd.xlane.f32.xlu1 %v102_v35 }
 0x239   :  { %v104_v36 = vpop.xlane.xlu1 %103 }
 0x23a   :  { %v105_v37 = vrot.slane %v104_v36, 4 }
 0x23c   :  { %v106_v38 = vadd.f32 %v105_v37, %v104_v36 }
 0x23e   :  { %v107_v39 = vrot.slane %v106_v38, 2 }
 0x240   :  { %v108_v40 = vadd.f32 %v107_v39, %v106_v38 }
 0x242   :  { %v109_v41 = vrot.slane %v108_v40, 1 }
 0x244   :  { %v110_v43 = vadd.f32 %v109_v41, %v108_v40 }
 0x246   :  { %v112_v44 = vadd.f32 %v111_v42, %v110_v43 }
 0x248   :  { %114 = vst.msk [vmem:[#allocation7] sm:$0x1] %vm43_vm0, %v112_v44 }
 0x24f   :  { %v118_v45 = vld [vmem:[#allocation7] sm:$0x1] }
 0x250   :  { %v119_v46 = vmul.f32 0.008928572, %v118_v45 }
 0x252   :  { %120 = vst.msk [vmem:[#allocation7] sm:$0x1] %vm43_vm0, %v119_v46 }
 0x253   :  { %208 = shalt.err (!%p205_p6)
}
 0x254   :  { %s209_s18 = scalar_lea.hbm %s301_s3, 16 }
 0x255   :  { %p210_p7 = scmp.ne.s32.totalorder %s301_s3, %s209_s18  ;;  %p213_p8 = scmp.lt.u32.totalorder %s209_s18, %s301_s3 }
 0x257   :  { %p215_p9 = pnand %p213_p8, %p210_p7 }
 0x259   :  { %218 = shalt.err (!%p215_p9)
}
 0x25a   :  { %130 = dma.vmem_to_hbm [thread:$0]  %s128_s2, 16, %s301_s3, [#allocation4]  }
 0x25b   :  { %223 = dma.done.wait [#allocation4], 16  }
 0x25c   :  { %224 = vsyncadd [#allocation4], 4294967280 }
 0x25d   :  { %134 = vsyncpa [#allocation3], 1 }
 0x25e   :  { %135 = vsyncpa [#allocation6], 1 }
 0x25f   :  { %136 = vsyncpa [#allocation4], 1 }

</bundles_post_ra>
